<compile_context>
chip_gen: v5e
topology: v5e:2x2
jax: 0.10.0
libtpu: 0.0.40
codegen_flags: <defaults>
</compile_context>

<pallas_src>
import functools
import math

import jax
import jax.numpy as jnp
from jax.experimental import pallas as pl
from jax.experimental.pallas import tpu as pltpu

_INV_SQRT2 = 1.0 / math.sqrt(2.0)


def _vmem_capacity_bytes():
    try:
        return int(pltpu.get_tpu_info().vmem_capacity_bytes)
    except Exception:
        return 64 << 20  # conservative default (v7x per-core VMEM)


def _compute_gate(avg, w1t, b1, w2t, b2):
    """avg: (Bt, C) f32  ->  sigmoid gate (Bt, C) f32 (mirrors the torch fc stack)."""
    h = jnp.dot(avg, w1t, preferred_element_type=jnp.float32) + b1      # (Bt, H1)
    # GELU, exact/erf variant (torch.nn.GELU default).
    h = 0.5 * h * (1.0 + jax.lax.erf(h * jnp.float32(_INV_SQRT2)))
    logits = jnp.dot(h, w2t, preferred_element_type=jnp.float32) + b2   # (Bt, C)
    return jax.nn.sigmoid(logits)


# ----------------------------------------------------------------------------
# Fast path: one fused kernel, grid over batch only.
# ----------------------------------------------------------------------------
def _ca_fused_kernel(x_ref, w1t_ref, b1_ref, w2t_ref, b2_ref, o_ref, *, inv_s):
    # Pool: float32 accumulation regardless of input dtype.  Last dim is the
    # full (unpadded) spatial extent, so sum * (1/S) is the exact mean.
    ssum = jnp.sum(x_ref[...].astype(jnp.float32), axis=2)              # (Bt, C)
    gate = _compute_gate(ssum * jnp.float32(inv_s),
                         w1t_ref[...], b1_ref[...], w2t_ref[...], b2_ref[...])
    # Re-read the block for the multiply: keeps live ranges short across the
    # FC chain; the reload is a cheap VMEM vld, not HBM traffic.
    o_ref[...] = (x_ref[...] * gate[:, :, None]).astype(o_ref.dtype)


# ----------------------------------------------------------------------------
# Large-S fallback, pass 1: S-tiled pooling (+ FC + sigmoid on the last tile).
# ----------------------------------------------------------------------------
def _ca_pool_kernel(x_ref, w1t_ref, b1_ref, w2t_ref, b2_ref, gate_ref, acc_ref,
                    *, inv_s, s_total, s_tile):
    s_idx = pl.program_id(1)

    @pl.when(s_idx == 0)
    def _init():
        acc_ref[...] = jnp.zeros_like(acc_ref)

    x = x_ref[...].astype(jnp.float32)                                   # (Bt, C, St)
    # Mask lanes past the true spatial extent (contents of the ragged last
    # tile's padding are undefined); cheap VPU work in a mem-bound kernel.
    lane = jax.lax.broadcasted_iota(jnp.int32, x.shape, dimension=2)
    valid = s_total - s_idx * s_tile
    x = jnp.where(lane < valid, x, 0.0)
    acc_ref[...] += jnp.sum(x, axis=2)                                   # (Bt, C)

    @pl.when(s_idx == pl.num_programs(1) - 1)
    def _finish():
        gate = _compute_gate(acc_ref[...] * jnp.float32(inv_s),
                             w1t_ref[...], b1_ref[...], w2t_ref[...], b2_ref[...])
        gate_ref[...] = gate[:, :, None]                                 # (Bt, C, 1)


# ----------------------------------------------------------------------------
# Large-S fallback, pass 2: tiled broadcast multiply.
# ----------------------------------------------------------------------------
def _ca_scale_kernel(x_ref, gate_ref, o_ref):
    o_ref[...] = (x_ref[...] * gate_ref[...]).astype(o_ref.dtype)


def ca_forward(x_nchw, w1, b1, w2, b2, *, donate_x=False,
               force_spatial_tiling=False, spatial_tile=None):
    """CA forward.

    x_nchw: (B, C, H, W)
    w1: (H1, C), b1: (1, H1), w2: (C, H1), b2: (1, C)   (nn.Linear layout)
    """
    B, C, H, W = x_nchw.shape
    S = H * W
    H1 = w1.shape[0]
    x = x_nchw.reshape(B, C, S)
    itemsize = x.dtype.itemsize

    # Generation-aware budgets.
    vmem_cap = _vmem_capacity_bytes()
    target_block_bytes = max(1 << 20, min(vmem_cap // 8, 16 << 20))
    weight_slack = 2 << 20

    # Transpose the tiny FC weights once so the kernel does (Bt,C)@(C,H1) and
    # (Bt,H1)@(H1,C) with no in-kernel transpose.
    w1t = w1.T  # (C, H1)
    w2t = w2.T  # (H1, C)
    inv_s = 1.0 / float(S)

    per_batch_bytes = C * S * itemsize

    # Batch tile: no divisibility requirement.  Cap so (a) the block is about
    # target_block_bytes and (b) there are >= MIN_STEPS grid steps when B allows.
    MIN_STEPS = 8  # >= 4 steps per TensorCore on 2-core (v7x) parts
    bt_by_bytes = max(1, target_block_bytes // per_batch_bytes)
    bt_by_steps = max(1, B // MIN_STEPS)
    Bt = int(max(1, min(B, bt_by_bytes, bt_by_steps)))
    n_b = pl.cdiv(B, Bt)

    # Single fused pass needs in+out blocks double-buffered (+ weight slack).
    fits_single = (4 * Bt * per_batch_bytes + weight_slack) <= int(0.75 * vmem_cap)
    # With B == 1 and a multi-MiB slab the fused pass has no pipelining at all;
    # the two-pass S-tiled scheme overlaps DMA and compute instead.
    pipelines_ok = (n_b >= 2) or (per_batch_bytes <= (4 << 20)) or (S < 256)
    use_fused = fits_single and pipelines_ok and not force_spatial_tiling

    if use_fused:
        block_bytes = Bt * per_batch_bytes
        vmem_limit = int(min(max(32 << 20, 4 * block_bytes + weight_slack),
                             int(0.85 * vmem_cap)))
        kernel = functools.partial(_ca_fused_kernel, inv_s=inv_s)
        out = pl.pallas_call(
            kernel,
            out_shape=jax.ShapeDtypeStruct((B, C, S), x.dtype),
            grid_spec=pltpu.PrefetchScalarGridSpec(
                num_scalar_prefetch=0,
                grid=(n_b,),
                in_specs=[
                    pl.BlockSpec((Bt, C, S), lambda b: (b, 0, 0)),
                    pl.BlockSpec((C, H1), lambda b: (0, 0)),
                    pl.BlockSpec((1, H1), lambda b: (0, 0)),
                    pl.BlockSpec((H1, C), lambda b: (0, 0)),
                    pl.BlockSpec((1, C), lambda b: (0, 0)),
                ],
                out_specs=pl.BlockSpec((Bt, C, S), lambda b: (b, 0, 0)),
            ),
            compiler_params=pltpu.CompilerParams(
                dimension_semantics=("parallel",),
                vmem_limit_bytes=vmem_limit,
            ),
            input_output_aliases={0: 0} if donate_x else {},
        )(x, w1t, b1, w2t, b2)
        return out.reshape(B, C, H, W)

    # ------------------------------------------------------------------
    # Fallback: per-batch slab too large (or forced) -> two S-tiled passes.
    # ------------------------------------------------------------------
    Bt = 1
    if spatial_tile is not None:
        St = int(spatial_tile)
        assert St % 128 == 0, "spatial_tile must be a multiple of 128"
    else:
        St = (target_block_bytes // (C * itemsize)) // 128 * 128
        St = max(128, min(St, ((S + 127) // 128) * 128))
    n_s = pl.cdiv(S, St)
    grid = (B, n_s)
    block_bytes = C * St * itemsize
    vmem_limit = int(min(max(32 << 20, 4 * block_bytes + weight_slack),
                         int(0.85 * vmem_cap)))

    # Pass 1: pooled mean -> FC -> sigmoid gate, accumulated over spatial tiles.
    pool_kernel = functools.partial(_ca_pool_kernel, inv_s=inv_s,
                                    s_total=S, s_tile=St)
    gates = pl.pallas_call(
        pool_kernel,
        out_shape=jax.ShapeDtypeStruct((B, C, 1), jnp.float32),
        grid_spec=pltpu.PrefetchScalarGridSpec(
            num_scalar_prefetch=0,
            grid=grid,
            in_specs=[
                pl.BlockSpec((Bt, C, St), lambda b, s: (b, 0, s)),
                pl.BlockSpec((C, H1), lambda b, s: (0, 0)),
                pl.BlockSpec((1, H1), lambda b, s: (0, 0)),
                pl.BlockSpec((H1, C), lambda b, s: (0, 0)),
                pl.BlockSpec((1, C), lambda b, s: (0, 0)),
            ],
            out_specs=pl.BlockSpec((Bt, C, 1), lambda b, s: (b, 0, 0)),
            scratch_shapes=[pltpu.VMEM((Bt, C), jnp.float32)],
        ),
        compiler_params=pltpu.CompilerParams(
            dimension_semantics=("parallel", "arbitrary"),
            vmem_limit_bytes=vmem_limit,
        ),
    )(x, w1t, b1, w2t, b2)

    # Pass 2: tiled broadcast multiply (both grid axes independent).
    out = pl.pallas_call(
        _ca_scale_kernel,
        out_shape=jax.ShapeDtypeStruct((B, C, S), x.dtype),
        grid_spec=pltpu.PrefetchScalarGridSpec(
            num_scalar_prefetch=0,
            grid=grid,
            in_specs=[
                pl.BlockSpec((Bt, C, St), lambda b, s: (b, 0, s)),
                pl.BlockSpec((Bt, C, 1), lambda b, s: (b, 0, 0)),
            ],
            out_specs=pl.BlockSpec((Bt, C, St), lambda b, s: (b, 0, s)),
        ),
        compiler_params=pltpu.CompilerParams(
            dimension_semantics=("parallel", "parallel"),
            vmem_limit_bytes=vmem_limit,
        ),
        input_output_aliases={0: 0} if donate_x else {},
    )(x, gates)
    return out.reshape(B, C, H, W)


def ca_reference(x_nchw, w1, b1, w2, b2):
    """Pure-JAX reference mirroring the PyTorch forward."""
    v = jnp.mean(x_nchw.astype(jnp.float32), axis=(2, 3))     # (B, C)
    h = v @ w1.T + b1                                         # (B, H1)
    h = 0.5 * h * (1.0 + jax.lax.erf(h * jnp.float32(_INV_SQRT2)))
    g = jax.nn.sigmoid(h @ w2.T + b2)                         # (B, C)
    return (x_nchw * g[:, :, None, None]).astype(x_nchw.dtype)


if __name__ == "__main__":
    # Small shapes consistent with the module: CA(C=32, r=16) -> hidden = 2.
    B, C, Hs, Ws = 2, 32, 16, 16
    r = 16
    H1 = max(C // r, 1)

    key = jax.random.PRNGKey(0)
    kx, k1, k2, k3, k4, kx2 = jax.random.split(key, 6)

    x = jax.random.normal(kx, (B, C, Hs, Ws), dtype=jnp.float32)

    # nn.Linear-style uniform init bounds.
    bound1 = 1.0 / math.sqrt(C)
    w1 = jax.random.uniform(k1, (H1, C), minval=-bound1, maxval=bound1, dtype=jnp.float32)
    b1 = jax.random.uniform(k2, (1, H1), minval=-bound1, maxval=bound1, dtype=jnp.float32)
    bound2 = 1.0 / math.sqrt(H1)
    w2 = jax.random.uniform(k3, (C, H1), minval=-bound2, maxval=bound2, dtype=jnp.float32)
    b2 = jax.random.uniform(k4, (1, C), minval=-bound2, maxval=bound2, dtype=jnp.float32)

    # Fast path, lane-aligned spatial extent (S = 256).
    out = jax.block_until_ready(ca_forward(x, w1, b1, w2, b2))
    ref = ca_reference(x, w1, b1, w2, b2)
    assert out.shape == (B, C, Hs, Ws)
    assert jnp.allclose(out, ref, atol=1e-5, rtol=1e-5), "fused path mismatch"

    # Fast path, ragged spatial extent (S = 225): no wrapper-side pad/slice.
    x2 = jax.random.normal(kx2, (B, C, 15, 15), dtype=jnp.float32)
    out2 = jax.block_until_ready(ca_forward(x2, w1, b1, w2, b2))
    ref2 = ca_reference(x2, w1, b1, w2, b2)
    assert jnp.allclose(out2, ref2, atol=1e-5, rtol=1e-5), "ragged fused path mismatch"

    # Force the large-S two-pass fallback on the same ragged input (exercises
    # the spatial accumulator and the masked final tile).
    out3 = jax.block_until_ready(
        ca_forward(x2, w1, b1, w2, b2, force_spatial_tiling=True, spatial_tile=128))
    assert jnp.allclose(out3, ref2, atol=1e-5, rtol=1e-5), "tiled fallback mismatch"

    print("KERNEL_OK")
</pallas_src>

<mosaic_0001>
module attributes {stable_mosaic.version = 11 : i64} {
  func.func @_ca_fused_kernel(%arg0: i32, %arg1: memref<1x32x256xf32, #tpu.memory_space<vmem>>, %arg2: memref<32x2xf32, #tpu.memory_space<vmem>>, %arg3: memref<1x2xf32, #tpu.memory_space<vmem>>, %arg4: memref<2x32xf32, #tpu.memory_space<vmem>>, %arg5: memref<1x32xf32, #tpu.memory_space<vmem>>, %arg6: memref<1x32x256xf32, #tpu.memory_space<vmem>>) attributes {dimension_semantics = [#tpu.dimension_semantics<parallel>], iteration_bounds = array<i64: 2>, scalar_prefetch = 0 : i64, scratch_operands = 0 : i64, tpu.core_type = #tpu.core_type<tc>, window_params = [{transform_indices = @transform_0, window_bounds = array<i64: 1, 32, 256>}, {pipeline_mode = #tpu.pipeline_mode<synchronous>, transform_indices = @transform_1, window_bounds = array<i64: 32, 2>}, {pipeline_mode = #tpu.pipeline_mode<synchronous>, transform_indices = @transform_2, window_bounds = array<i64: 1, 2>}, {pipeline_mode = #tpu.pipeline_mode<synchronous>, transform_indices = @transform_3, window_bounds = array<i64: 2, 32>}, {pipeline_mode = #tpu.pipeline_mode<synchronous>, transform_indices = @transform_4, window_bounds = array<i64: 1, 32>}, {transform_indices = @transform_5, window_bounds = array<i64: 1, 32, 256>}]} {
    %c0 = arith.constant 0 : index
    %c0_0 = arith.constant 0 : index
    %c0_1 = arith.constant 0 : index
    %0 = vector.load %arg1[%c0, %c0_0, %c0_1] : memref<1x32x256xf32, #tpu.memory_space<vmem>>, vector<1x32x256xf32>
    %cst = arith.constant dense<0.000000e+00> : vector<1x32xf32>
    %1 = vector.multi_reduction <add>, %0, %cst [2] : vector<1x32x256xf32> to vector<1x32xf32>
    %cst_2 = arith.constant 3.906250e-03 : f32
    %2 = vector.broadcast %cst_2 : f32 to vector<1x32xf32>
    %3 = arith.mulf %1, %2 : vector<1x32xf32>
    %c0_3 = arith.constant 0 : index
    %c0_4 = arith.constant 0 : index
    %4 = vector.load %arg2[%c0_3, %c0_4] : memref<32x2xf32, #tpu.memory_space<vmem>>, vector<32x2xf32>
    %c0_5 = arith.constant 0 : index
    %c0_6 = arith.constant 0 : index
    %5 = vector.load %arg3[%c0_5, %c0_6] : memref<1x2xf32, #tpu.memory_space<vmem>>, vector<1x2xf32>
    %c0_7 = arith.constant 0 : index
    %c0_8 = arith.constant 0 : index
    %6 = vector.load %arg4[%c0_7, %c0_8] : memref<2x32xf32, #tpu.memory_space<vmem>>, vector<2x32xf32>
    %c0_9 = arith.constant 0 : index
    %c0_10 = arith.constant 0 : index
    %7 = vector.load %arg5[%c0_9, %c0_10] : memref<1x32xf32, #tpu.memory_space<vmem>>, vector<1x32xf32>
    %cst_11 = arith.constant dense<0.000000e+00> : vector<1x2xf32>
    %8 = tpu.matmul %3, %4, %cst_11 {dimension_numbers = #tpu.dot_dimension_numbers<[1], [0], [0], [1], [0, 0, 1, 1], [], []>} : vector<1x32xf32>, vector<32x2xf32>, vector<1x2xf32> -> vector<1x2xf32>
    %9 = arith.addf %8, %5 : vector<1x2xf32>
    %cst_12 = arith.constant 5.000000e-01 : f32
    %10 = vector.broadcast %cst_12 : f32 to vector<1x2xf32>
    %11 = arith.mulf %10, %9 : vector<1x2xf32>
    %cst_13 = arith.constant 0.707106769 : f32
    %12 = vector.broadcast %cst_13 : f32 to vector<1x2xf32>
    %13 = arith.mulf %9, %12 : vector<1x2xf32>
    %14 = math.erf %13 : vector<1x2xf32>
    %cst_14 = arith.constant 1.000000e+00 : f32
    %15 = vector.broadcast %cst_14 : f32 to vector<1x2xf32>
    %16 = arith.addf %15, %14 : vector<1x2xf32>
    %17 = arith.mulf %11, %16 : vector<1x2xf32>
    %cst_15 = arith.constant dense<0.000000e+00> : vector<1x32xf32>
    %18 = tpu.matmul %17, %6, %cst_15 {dimension_numbers = #tpu.dot_dimension_numbers<[1], [0], [0], [1], [0, 0, 1, 1], [], []>} : vector<1x2xf32>, vector<2x32xf32>, vector<1x32xf32> -> vector<1x32xf32>
    %19 = arith.addf %18, %7 : vector<1x32xf32>
    %20 = arith.negf %19 : vector<1x32xf32>
    %21 = math.exp %20 : vector<1x32xf32>
    %cst_16 = arith.constant 1.000000e+00 : f32
    %22 = vector.broadcast %cst_16 : f32 to vector<1x32xf32>
    %23 = arith.addf %22, %21 : vector<1x32xf32>
    %24 = arith.divf %22, %23 : vector<1x32xf32>
    %c0_17 = arith.constant 0 : index
    %c0_18 = arith.constant 0 : index
    %c0_19 = arith.constant 0 : index
    %25 = vector.load %arg1[%c0_17, %c0_18, %c0_19] : memref<1x32x256xf32, #tpu.memory_space<vmem>>, vector<1x32x256xf32>
    %26 = vector.shape_cast %24 : vector<1x32xf32> to vector<1x32x1xf32>
    %27 = vector.broadcast %26 : vector<1x32x1xf32> to vector<1x32x256xf32>
    %28 = arith.mulf %25, %27 : vector<1x32x256xf32>
    %c0_20 = arith.constant 0 : index
    %c0_21 = arith.constant 0 : index
    %c0_22 = arith.constant 0 : index
    %29 = vector.load %arg6[%c0_20, %c0_21, %c0_22] : memref<1x32x256xf32, #tpu.memory_space<vmem>>, vector<1x32x256xf32>
    tpu.vector_store %arg6[%c0_20, %c0_21, %c0_22], %28 {strides = array<i32>} : memref<1x32x256xf32, #tpu.memory_space<vmem>>, vector<1x32x256xf32>,
    return
  }
  func.func @transform_0(%arg0: i32) -> (i32, i32, i32) {
    %c0_i32 = arith.constant 0 : i32
    %c0_i32_0 = arith.constant 0 : i32
    %c0_i32_1 = arith.constant 0 : i32
    return %arg0, %c0_i32, %c0_i32_0 : i32, i32, i32
  }
  func.func @transform_1(%arg0: i32) -> (i32, i32) {
    %c0_i32 = arith.constant 0 : i32
    %c0_i32_0 = arith.constant 0 : i32
    %c0_i32_1 = arith.constant 0 : i32
    return %c0_i32, %c0_i32_0 : i32, i32
  }
  func.func @transform_2(%arg0: i32) -> (i32, i32) {
    %c0_i32 = arith.constant 0 : i32
    %c0_i32_0 = arith.constant 0 : i32
    %c0_i32_1 = arith.constant 0 : i32
    return %c0_i32, %c0_i32_0 : i32, i32
  }
  func.func @transform_3(%arg0: i32) -> (i32, i32) {
    %c0_i32 = arith.constant 0 : i32
    %c0_i32_0 = arith.constant 0 : i32
    %c0_i32_1 = arith.constant 0 : i32
    return %c0_i32, %c0_i32_0 : i32, i32
  }
  func.func @transform_4(%arg0: i32) -> (i32, i32) {
    %c0_i32 = arith.constant 0 : i32
    %c0_i32_0 = arith.constant 0 : i32
    %c0_i32_1 = arith.constant 0 : i32
    return %c0_i32, %c0_i32_0 : i32, i32
  }
  func.func @transform_5(%arg0: i32) -> (i32, i32, i32) {
    %c0_i32 = arith.constant 0 : i32
    %c0_i32_0 = arith.constant 0 : i32
    %c0_i32_1 = arith.constant 0 : i32
    return %arg0, %c0_i32, %c0_i32_0 : i32, i32, i32
  }
}

</mosaic_0001>

<bundles_post_ra>
// kernel: tpu_custom_call.1
= control target key start
LH: loop header
LB: loop body
LE: loop exit
PB: predicated region body
PF: predicated region fallthrough
CT: control target
= control target key end

     0   :  { %10 = vsyncpa [#allocation3], 0  ;;  %s939_s0 = inlined_call_operand.hbm [shape: f32[2,32,256], index: 0, kind: input, shape index: {}]   ;;  %s940_s1 = inlined_call_operand.vmem [shape: f32[32,2], index: 1, kind: input, shape index: {}]   ;;  %s941_s2 = inlined_call_operand.vmem [shape: f32[1,2], index: 2, kind: input, shape index: {}]   ;;  %s942_s3 = inlined_call_operand.vmem [shape: f32[2,32], index: 3, kind: input, shape index: {}]   ;;  %s943_s4 = inlined_call_operand.vmem [shape: f32[1,32], index: 4, kind: input, shape index: {}]   ;;  %s944_s5 = inlined_call_operand.hbm [shape: f32[2,32,256], index: 5, kind: output, shape index: {}]  }
   0x1   :  { %12 = vsyncpa [#allocation3 + $0x1], 0 }
   0x2   :  { %13 = vsyncpa [#allocation4], 0 }
   0x3   :  { %15 = vsyncpa [#allocation4 + $0x1], 0  ;;  %s753_s18 = smov 0   ;;  %s755_s19 = smov 0  }
   0x4   :  { %s757_s20 = smov 0   ;;  %s759_s21 = smov 0  }
   0x5 LB: > { %s774_s22 = sadd.s32 4294967295, %s717_s21   ;;  %s539_s23 = sadd.s32 4294967294, %s717_s21   ;;  %s717_s21 = sphi %s759_s21, %s954_s21   ;;  %s713_s20 = sphi %s757_s20, %s953_s20   ;;  %s709_s19 = sphi %s755_s19, %s952_s19   ;;  %s705_s18 = sphi %s753_s18, %s951_s18  }
   0x6   : > { %s778_s24 = sadd.s32 1, %s717_s21   ;;  %s28_s25 = sadd.s32 1, %s713_s20 }
   0x7   : > { %s25_s26 = ssub.s32 %s717_s21, %s778_s24  ;;  %p35_p0 = scmp.ne.s32.totalorder %s713_s20, %s709_s19 }
   0x8   : > { %p26_p1 = scmp.eq.s32.totalorder %s25_s26, 0  ;;  %p36_p2 = scmp.eq.s32.totalorder %s717_s21, 0 }
   0x9   : > { %p41_p3 = scmp.ne.s32.totalorder %s709_s19, %s705_s18  ;;  %p42_p4 = scmp.eq.s32.totalorder %s774_s22, 0 }
   0xa   : > { %s790_s27 = scalar_select %p26_p1, %s713_s20, %s28_s25  }
   0xb   : > { %p792_p5 = por %p36_p2, %p35_p0  ;;  %p796_p6 = por %p42_p4, %p41_p3 }
   0xc   : > { %p149_p7 = scmp.eq.s32.totalorder %s774_s22, 1  ;;  %p155_p8 = scmp.eq.s32.totalorder %s539_s23, 1 }
   0xd   : > { %p572_p10 = scmp.lt.s32.totalorder %s717_s21, 2  ;;  %s187_s7 = sand.u32 1, %s713_s20  }
   0xe   : > { %p803_p11 = por %p149_p7, %p35_p0  ;;  %p807_p12 = por %p155_p8, %p41_p3 }
   0xf   : > { %s558_s8 = sshll.u32 %s717_s21, 6  ;;  %s542_s9 = sshll.u32 %s187_s7, 6 }
  0x10   : > { %s196_s12 = scalar_lea.hbm %s939_s0, %s558_s8  ;;  %s191_s14 = scalar_lea.vmem [#allocation2], %s542_s9 }
  0x11   : > { %s197_s13 = sshll.u32 %s196_s12, 4  ;;  %s199_s15 = sshll.u32 %s191_s14, 4  ;;  %s198_s13 = int_to_ptr.hbm [resolvable:$true] %s197_s13  ;;  %s200_s15 = int_to_ptr.vmem [resolvable:$true] %s199_s15 }
  0x12   : > { %p818_p13 = pnand %p572_p10, %p792_p5  ;;  %p545_p0 = scmp.ge.s32.totalorder %s717_s21, 1 }
  0x13   : > { %p207_p1 = scmp.lt.s32.totalorder %s717_s21, 3  ;;  %s188_s17 = scalar_lea.sflag [#allocation3], %s187_s7 }
  0x14   : > { %s621_s23 = sshra.s32 %s198_s13, 4  ;;  %p625_p3 = pneg %p818_p13  ;;  %s622_s23 = int_to_ptr.hbm [resolvable:$true] %s621_s23 }
  0x15   : > { %s623_s25 = scalar_lea.hbm %s622_s23, 64  ;;  %s628_s28 = scalar_lea.hbm %s939_s0, 128 }
  0x16   : > { %p624_p2 = scmp.ne.s32.totalorder %s622_s23, %s623_s25  ;;  %p629_p5 = scmp.lt.s32.totalorder %s622_s23, %s939_s0 }
  0x17   : > { %p630_p8 = scmp.lt.s32.totalorder %s628_s28, %s623_s25 }
  0x18   : > { %p626_p4 = pnand %p625_p3, %p624_p2 }
  0x19   : > { %p631_p10 = por %p630_p8, %p629_p5 }
  0x1a   : > { %p627_p7 = pneg %p626_p4 }
  0x1c   : > { %p632_p9 = pnand %p631_p10, %p627_p7 }
  0x1e   : > { %635 = shalt.err (!%p632_p9)
}
  0x1f   : > { %s719_s7 = smov 256   ;;  %s720_s11 = smov 16  }
  0x20   : > { %567 = dma.hbm_to_vmem [thread:$0]  (!%p818_p13), %s198_s13, 1024, %s200_s15, %s188_s17, %s719_s7, %s719_s7, %s720_s11  }
  0x21   : > { %p208_p2 = pnand %p545_p0, %p207_p1 }
  0x22   : > { %s839_s12 = sand.u32 (!%p208_p2), 1, %s709_s19  }
  0x23   : > { %211 = sbr.rel (%p208_p2) target bundleno = 636 (0x27c), region = 40  ;;  %s546_s14 = sshll.u32 (!%p208_p2), %s839_s12, 6 }
  0x24   : > { %s214_s23 = scalar_lea.sflag (!%p208_p2), [#allocation3], %s839_s12  ;;  %s217_s25 = scalar_lea.vmem (!%p208_p2), [#allocation2], %s546_s14 }
  0x28   : > { %696 = dma.done.wait (%p796_p6), %s214_s23, 1024  }
  0x29   : > { %698 = vsyncadd (%p796_p6), %s214_s23, 4294966272  ;;  %v849_v0 = vld [vmem:[%s217_s25] sm:$0xff]  ;;  %v851_v1 = vld [vmem:[%s217_s25 + $0x8] sm:$0xff]  ;;  %v280_v16 = vlaneseq  ;;  %vm285_vm0 = vcmask 130112   ;;  %vm289_vm1 = vcmask 195712   ;;  %vm293_vm2 = vcmask 261312  }
  0x2a   : > { %v853_v2 = vld [vmem:[%s217_s25 + $0x20] sm:$0xff]  ;;  %v253_v3 = vadd.f32 %v851_v1, %v849_v0  ;;  %v857_v4 = vld [vmem:[%s217_s25 + $0x28] sm:$0xff]  ;;  %v861_v6 = vld [vmem:[%s217_s25 + $0x10] sm:$0xff]  ;;  %vm295_vm3 = vcmask 261120   ;;  %vm366_vm4 = vcmask 1041408   ;;  %vm362_vm9 = vcmask 15360  }
  0x2b   : > { %v259_v5 = vadd.f32 %v857_v4, %v853_v2  ;;  %v863_v7 = vld [vmem:[%s217_s25 + $0x18] sm:$0xff]  ;;  %v865_v8 = vld [vmem:[%s217_s25 + $0x30] sm:$0xff]  ;;  %v270_v14 = vld [vmem:[%s940_s1 + $0x8] sm:$0xff]  ;;  %v281_v19 = vand.u32 127, %v280_v16  ;;  %s244_s29 = scalar_lea.vmem [#allocation5], %s546_s14  ;;  %s559_s13 = sshll.u32 %s774_s22, 6 }
  0x2c   : > { %254 = vadd.xlane.f32.xlu0 %v253_v3  ;;  %v867_v9 = vld [vmem:[%s217_s25 + $0x38] sm:$0xff]  ;;  %v256_v10 = vadd.f32 %v863_v7, %v861_v6  ;;  %v271_v13 = vld [vmem:[%s940_s1 + $0x10] sm:$0xff]  ;;  %v269_v15 = vld [vmem:[%s940_s1] sm:$0xff]  ;;  %s462_s17 = scalar_lea.hbm %s944_s5, %s559_s13  ;;  %s463_s26 = sshll.u32 %s244_s29, 4  ;;  %s464_s26 = int_to_ptr.vmem [resolvable:$true] %s463_s26 }
  0x2d   : > { %260 = vadd.xlane.f32.xlu1 %v259_v5  ;;  %v262_v11 = vadd.f32 %v867_v9, %v865_v8  ;;  %v272_v12 = vld [vmem:[%s940_s1 + $0x18] sm:$0xff]  ;;  %v283_v21 = vadd.s32 4294967288, %v281_v19  ;;  %v287_v22 = vadd.s32 4294967280, %v281_v19  ;;  %v291_v25 = vadd.s32 4294967272, %v281_v19  ;;  %v273_v36 = vld [vmem:[%s941_s2] sm:$0x1] }
  0x2e   : > { %310 = vmatpush.msra.mxu0 %v272_v12  ;;  %v274_v48 = vld [vmem:[%s942_s3] sm:$0x3]  ;;  %s465_s8 = sshll.u32 %s462_s17, 4  ;;  %s451_s22 = scalar_lea.sflag [#allocation4], %s839_s12  ;;  %s466_s8 = int_to_ptr.hbm [resolvable:$true] %s465_s8 }
  0x2f   : > { %550 = vmatpush.msk.msra.mxu1 %vm366_vm4, %v274_v48  ;;  %s665_s14 = sshra.s32 %s466_s8, 4  ;;  %s671_s7 = scalar_lea.hbm %s944_s5, 128  ;;  %s666_s14 = int_to_ptr.hbm [resolvable:$true] %s665_s14 }
  0x30   : > { %311 = vmatpush.msra.mxu0 %v271_v13  ;;  %s667_s28 = scalar_lea.hbm %s666_s14, 64  ;;  %p672_p0 = scmp.lt.s32.totalorder %s666_s14, %s944_s5 }
  0x31   : > { %p668_p6 = scmp.ne.s32.totalorder %s666_s14, %s667_s28  ;;  %p673_p1 = scmp.lt.s32.totalorder %s671_s7, %s667_s28 }
  0x32   : > { %312 = vmatpush.msra.mxu0 %v270_v14 }
  0x33   : > { %p669_p9 = pnand %p668_p6, %p803_p11  ;;  %p674_p3 = por %p673_p1, %p672_p0 }
  0x34   : > { %257 = vadd.xlane.f32.xlu0 %v256_v10  ;;  %313 = vmatpush.msra.mxu0 %v269_v15 }
  0x35   : > { %263 = vadd.xlane.f32.xlu1 %v262_v11  ;;  %p670_p13 = pneg %p669_p9 }
  0x37   : > { %p675_p4 = pnand %p674_p3, %p670_p13 }
  0x9f   : > { %v255_v17 = vpop.xlane.xlu0 %254 }
  0xa0   : > { %v261_v18 = vpop.xlane.xlu1 %260  ;;  %v265_v20 = vmul.f32 0.00390625, %v255_v17 }
  0xa1   : > { %v267_v23 = vmul.f32 0.00390625, %v261_v18 }
  0xa2   : > { %v282_v29 = vperm.slane %v265_v20, %v281_v19 }
  0xa3   : > { %v288_v31 = vperm.slane %v267_v23, %v287_v22 }
  0xa7   : > { %v258_v24 = vpop.xlane.xlu0 %257 }
  0xa8   : > { %v266_v26 = vmul.f32 0.00390625, %v258_v24  ;;  %v264_v27 = vpop.xlane.xlu1 %263  ;;  %v411_v24 = vshrl.u32 %v280_v16, 7 }
  0xa9   : > { %v268_v28 = vmul.f32 0.00390625, %v264_v27  ;;  %v275_v27 = vld [vmem:[%s943_s4] sm:$0x1] }
  0xaa   : > { %v284_v30 = vperm.slane %v266_v26, %v283_v21  ;;  %610 = vset.pattern.permute.xlu2 %v411_v24  ;;  %v424_v26 = vadd.s32 16, %v411_v24 }
  0xab   : > { %v292_v32 = vperm.slane %v268_v28, %v291_v25  ;;  %v430_v25 = vadd.s32 24, %v411_v24 }
  0xac   : > { %v286_v33 = vsel %vm285_vm0, %v284_v30, %v282_v29  ;;  %612 = vset.pattern.permute.xlu0 %v424_v26 }
  0xad   : > { %v290_v34 = vsel %vm289_vm1, %v288_v31, %v286_v33  ;;  %613 = vset.pattern.permute.xlu1 %v430_v25 }
  0xae   : > { %v294_v35 = vsel %vm293_vm2, %v292_v32, %v290_v34 }
  0xaf   : > { %548 = vmatmul.msk.f32.vlgmr.msra.gmra.mxu0 %vm295_vm3, %v294_v35 }
 0x12c   : > { %v315_v37 = vpop.f32.mrf.mxu0 }
 0x12d   : > { %v316_v38 = vadd.f32 %v315_v37, %v273_v36 }
 0x12f   : > { %v319_v39 = vmul.f32 0.70710677, %v316_v38  ;;  %v318_v21 = vmul.f32 0.5, %v316_v38 }
 0x131   : > { %v320_v40 = vmul.f32 %v319_v39, %v319_v39 }
 0x133   : > { %v321_v41 = vmin.f32 %v320_v40, 16.0 }
 0x135   : > { %v322_v42 = vmul.f32 2.1237322e-06, %v321_v41  ;;  %v333_v43 = vmul.f32 3.8918573e-05, %v321_v41 }
 0x137   : > { %v323_v44 = vadd.f32 0.00028619796, %v322_v42  ;;  %v334_v45 = vadd.f32 0.001143296, %v333_v43  ;;  %v418_v43 = vadd.s32 8, %v411_v24 }
 0x139   : > { %v324_v46 = vmul.f32 %v323_v44, %v321_v41  ;;  %v335_v47 = vmul.f32 %v334_v45, %v321_v41 }
 0x13b   : > { %v336_v49 = vadd.f32 0.014752088, %v335_v47  ;;  %v325_v50 = vadd.f32 0.0036580483, %v324_v46 }
 0x13d   : > { %v337_v51 = vmul.f32 %v336_v49, %v321_v41  ;;  %v326_v53 = vmul.f32 %v325_v50, %v321_v41 }
 0x13f   : > { %v338_v52 = vadd.f32 0.112945676, %v337_v51  ;;  %v327_v56 = vadd.f32 0.05243302, %v326_v53 }
 0x141   : > { %v339_v54 = vmul.f32 %v338_v52, %v321_v41  ;;  %v328_v59 = vmul.f32 %v327_v56, %v321_v41 }
 0x143   : > { %v340_v55 = vadd.f32 0.4994258, %v339_v54  ;;  %v329_v60 = vadd.f32 0.18741608, %v328_v59 }
 0x145   : > { %v341_v57 = vmul.f32 %v340_v55, %v321_v41  ;;  %v330_v62 = vmul.f32 %v329_v60, %v321_v41 }
 0x147   : > { %v342_v58 = vadd.f32 1.0, %v341_v57  ;;  %v331_v10 = vadd.f32 1.1283791, %v330_v62 }
 0x149   : > { %615 = vrcp.f32 %v342_v58  ;;  %v354_v5 = vand.u32 2147483648, %v342_v58  ;;  %v352_v12 = vand.u32 2147483647, %v342_v58  ;;  %vm348_vm6 = vweird.f32 %v342_v58 }
 0x14a   : > { %v332_v15 = vmul.f32 %v331_v10, %v319_v39 }
 0x14b   : > { %v355_v14 = vor.u32 1.1754944e-38, %v354_v5  ;;  %vm353_vm8 = vcmp.eq.f32.partialorder %v352_v12, 8.507059e+37 }
 0x14f   : > { %v616_v61 = vpop.eup %615 }
 0x150   : > { %v344_v63 = vmul.f32 %v616_v61, %v342_v58  ;;  %vm349_vm5 = vweird.f32 %v616_v61 }
 0x151   : > { %vm350_vm7 = vmor %vm348_vm6, %vm349_vm5 }
 0x152   : > { %v345_v3 = vsub.f32 1.0, %v344_v63 }
 0x154   : > { %v346_v11 = vmul.f32 %v616_v61, %v345_v3 }
 0x156   : > { %v347_v13 = vadd.f32 %v616_v61, %v346_v11 }
 0x158   : > { %v351_v17 = vsel %vm350_vm7, %v616_v61, %v347_v13 }
 0x159   : > { %v356_v18 = vsel %vm353_vm8, %v355_v14, %v351_v17 }
 0x15a   : > { %v357_v19 = vmul.f32 %v356_v18, %v332_v15 }
 0x15c   : > { %v549_v20 = vclamps-f32 %v357_v19, 1.0 }
 0x15e   : > { %v360_v22 = vadd.f32 1.0, %v549_v20 }
 0x160   : > { %v361_v23 = vmul.f32 %v360_v22, %v318_v21 }
 0x162   : > { %551 = vmatmul.msk.f32.vlgmr.msra.gmra.mxu1 %vm362_vm9, %v361_v23 }
 0x1df   : > { %v387_v28 = vpop.f32.mrf.mxu1 }
 0x1e0   : > { %v388_v29 = vadd.f32 %v387_v28, %v275_v27 }
 0x1e2   : > { %v552_v30 = vmul.f32 -1.442695, %v388_v29 }
 0x1e4   : > { %617 = vpow2.f32 %v552_v30 }
 0x1ea   : > { %v618_v31 = vpop.eup %617 }
 0x1eb   : > { %v393_v32 = vadd.f32 1.0, %v618_v31 }
 0x1ed   : > { %619 = vrcp.f32 %v393_v32  ;;  %v405_v16 = vand.u32 2147483648, %v393_v32  ;;  %v403_v37 = vand.u32 2147483647, %v393_v32  ;;  %vm399_vm11 = vweird.f32 %v393_v32 }
 0x1ef   : > { %v406_v39 = vor.u32 1.1754944e-38, %v405_v16  ;;  %vm404_vm13 = vcmp.eq.f32.partialorder %v403_v37, 8.507059e+37 }
 0x1f3   : > { %v620_v33 = vpop.eup %619 }
 0x1f4   : > { %v395_v34 = vmul.f32 %v620_v33, %v393_v32  ;;  %vm400_vm10 = vweird.f32 %v620_v33 }
 0x1f5   : > { %vm401_vm12 = vmor %vm399_vm11, %vm400_vm10 }
 0x1f6   : > { %v396_v35 = vsub.f32 1.0, %v395_v34 }
 0x1f8   : > { %v397_v36 = vmul.f32 %v620_v33, %v396_v35 }
 0x1fa   : > { %v398_v38 = vadd.f32 %v620_v33, %v397_v36 }
 0x1fc   : > { %v402_v40 = vsel %vm401_vm12, %v620_v33, %v398_v38 }
 0x1fd   : > { %v407_v41 = vsel %vm404_vm13, %v406_v39, %v402_v40 }
 0x1fe   : > { %v409_v42 = vperm.slane %v407_v41, 0 }
 0x200   : > { %432 = vperm.xlu1 %613, %v409_v42   ;;  %426 = vperm.xlu0 %612, %v409_v42  }
 0x201   : > { %414 = vperm.xlu2 %610, %v409_v42  }
 0x208   : > { %614 = vset.pattern.permute.xlu0 %v430_v25 }
 0x209   : > { %611 = vset.pattern.permute.xlu2 %v418_v43 }
 0x211   : > { %420 = vperm.xlu2 %611, %v409_v42  }
 0x25b   : > { %v415_v44 = vpop.permute.xlu2 %414 }
 0x25c   : > { %v434_v45 = vmul.f32 %v415_v44, %v849_v0  ;;  %v435_v46 = vmul.f32 %v415_v44, %v851_v1 }
 0x25e   : > { %442 = vst [vmem:[%s244_s29] sm:$0xff] %v434_v45 }
 0x25f   : > { %443 = vst [vmem:[%s244_s29 + $0x8] sm:$0xff] %v435_v46 }
 0x26b   : > { %v421_v47 = vpop.permute.xlu2 %420 }
 0x26c   : > { %v436_v48 = vmul.f32 %v421_v47, %v861_v6  ;;  %v437_v49 = vmul.f32 %v421_v47, %v863_v7 }
 0x26e   : > { %444 = vst [vmem:[%s244_s29 + $0x10] sm:$0xff] %v436_v48 }
 0x26f   : > { %445 = vst [vmem:[%s244_s29 + $0x18] sm:$0xff] %v437_v49 }
 0x272   : > { %v433_v0 = vpop.permute.xlu1 %432  ;;  %v427_v1 = vpop.permute.xlu0 %426 }
 0x273   : > { %v440_v50 = vmul.f32 %v433_v0, %v865_v8  ;;  %v441_v51 = vmul.f32 %v433_v0, %v867_v9  ;;  %v438_v6 = vmul.f32 %v427_v1, %v853_v2  ;;  %v439_v7 = vmul.f32 %v427_v1, %v857_v4 }
 0x275   : > { %448 = vst [vmem:[%s244_s29 + $0x30] sm:$0xff] %v440_v50 }
 0x276   : > { %449 = vst [vmem:[%s244_s29 + $0x38] sm:$0xff] %v441_v51 }
 0x277   : > { %446 = vst [vmem:[%s244_s29 + $0x20] sm:$0xff] %v438_v6 }
 0x278   : > { %447 = vst [vmem:[%s244_s29 + $0x28] sm:$0xff] %v439_v7 }
 0x279   : > { %678 = shalt.err (!%p675_p4)
}
 0x27a   : > { %s721_s12 = smov 256   ;;  %s722_s25 = smov 16  }
 0x27b   : > { %562 = dma.vmem_to_hbm [thread:$0]  (%p803_p11), %s464_s26, 1024, %s466_s8, %s451_s22, %s721_s12, %s721_s12, %s722_s25  }
 0x27c PF: > { %s480_s29 = sand.u32 1, %s705_s18   ;;  %p950_p7 = scmp.ge.s32.totalorder %s717_s21, 2 }
 0x27d   : > { %s481_s13 = scalar_lea.sflag [#allocation4], %s480_s29 }
 0x27e   : > { %p569_p5 = pnand %p950_p7, %p807_p12 }
 0x280   : > { %p570_p8 = pneg %p569_p5 }
 0x282   : > { %700 = dma.done.wait (%p570_p8), %s481_s13, 1024  }
 0x283   : > { %702 = vsyncadd (%p570_p8), %s481_s13, 4294966272  ;;  %p18_p10 = scmp.ge.s32.totalorder %s778_s24, 4   ;;  %s951_s18 = smov %s709_s19 }
 0x284   : > { %s952_s19 = smov %s713_s20  ;;  %s953_s20 = smov %s790_s27 }
 0x285   : > { %s954_s21 = smov %s778_s24  ;;  %20 = sbr.rel (!%p18_p10) target bundleno = 5 (0x5), region = 85 }
 0x28a   :  { %487 = vsyncpa [#allocation3], 1 }
 0x28b   :  { %489 = vsyncpa [#allocation3 + $0x1], 1 }
 0x28c   :  { %490 = vsyncpa [#allocation4], 1 }
 0x28d   :  { %492 = vsyncpa [#allocation4 + $0x1], 1 }

</bundles_post_ra>
